<compile_context>
chip_gen: v7x
topology: tpu7x:2x2x1
jax: 0.10.0
libtpu: 0.0.40
codegen_flags: <defaults>
</compile_context>

<pallas_src>
import jax
import jax.numpy as jnp
from jax.experimental import pallas as pl
from jax.experimental.pallas import tpu as pltpu


def mlp_small_kernel(x_ref, w1_ref, b1_ref, w2_ref, b2_ref, o_ref):
    # Layer 1: (TILE_B, D) @ (D, 10) on the MXU, fp32 accumulation.
    h = jnp.dot(x_ref[...], w1_ref[...], preferred_element_type=jnp.float32)
    h = jnp.maximum(h + b1_ref[...], 0.0)  # bias + ReLU on the VPU
    # Layer 2 (10 -> 1): broadcast-multiply + lane reduction instead of a
    # second MXU matmul (which would pad K=10, N=1 up to the systolic tile).
    y = jnp.sum(h * w2_ref[...], axis=-1, keepdims=True) + b2_ref[0, 0]
    o_ref[...] = y.astype(o_ref.dtype)
    # TODO(synk): output last dim is 1 -> masked vst; a lane-dense (B,) layout
    # would need a sublane->lane relayout and the store traffic here is tiny.


def _pick_tile_b(batch, input_dim, target_tile_bytes=2 << 20):
    """Biggest batch tile (multiple of 8, capped at 2048) whose fp32 x tile is
    ~<= 2 MiB, so the double-buffered stream stays far below v7x's 64 MiB VMEM."""
    t = (target_tile_bytes // (4 * input_dim)) // 8 * 8
    t = max(8, min(2048, t))
    return batch if batch <= t else t


@jax.jit
def mlp_small_forward(x, w1, b1, w2, b2):
    """Forward pass of MLPSmall as a single batch-tiled Pallas kernel.

    x  : (B, D)   float32
    w1 : (D, 10)  float32
    b1 : (10,)    float32
    w2 : (10, 1)  float32
    b2 : (1,)     float32
    returns (B, 1) float32
    """
    B, D = x.shape
    H = w1.shape[1]

    TILE_B = _pick_tile_b(B, D)
    n_tiles = pl.cdiv(B, TILE_B)
    B_pad = n_tiles * TILE_B
    if B_pad != B:
        x = jnp.pad(x, ((0, B_pad - B), (0, 0)))

    b1_2d = b1.reshape(1, H)       # (1, 10)
    w2_row = w2.reshape(1, H)      # (1, 10): second-layer weights as a row
    b2_2d = b2.reshape(1, 1)       # scalar, lives in SMEM

    out = pl.pallas_call(
        mlp_small_kernel,
        out_shape=jax.ShapeDtypeStruct((B_pad, 1), jnp.float32),
        grid=(n_tiles,),
        in_specs=[
            pl.BlockSpec((TILE_B, D), lambda i: (i, 0)),        # x: streamed tiles
            pl.BlockSpec((D, H), lambda i: (0, 0)),             # w1: VMEM-resident
            pl.BlockSpec((1, H), lambda i: (0, 0)),             # b1: VMEM-resident
            pl.BlockSpec((1, H), lambda i: (0, 0)),             # w2 row: resident
            pl.BlockSpec(memory_space=pltpu.MemorySpace.SMEM),  # b2: SMEM scalar
        ],
        out_specs=pl.BlockSpec((TILE_B, 1), lambda i: (i, 0)),
        compiler_params=pltpu.CompilerParams(
            dimension_semantics=("parallel",),  # megacore sharding on v7x
        ),
    )(x, w1, b1_2d, w2_row, b2_2d)

    return out[:B]


def init_params(key, input_dim):
    """Deterministic init mimicking torch.nn.Linear default (uniform +-1/sqrt(fan_in)).

    Weights are stored transposed relative to PyTorch ((in, out) instead of
    (out, in)) so the kernel can use them without a transpose.
    """
    k1, k2, k3, k4 = jax.random.split(key, 4)
    bound1 = 1.0 / jnp.sqrt(jnp.float32(input_dim))
    bound2 = 1.0 / jnp.sqrt(jnp.float32(10))
    w1 = jax.random.uniform(k1, (input_dim, 10), jnp.float32, -bound1, bound1)
    b1 = jax.random.uniform(k2, (10,), jnp.float32, -bound1, bound1)
    w2 = jax.random.uniform(k3, (10, 1), jnp.float32, -bound2, bound2)
    b2 = jax.random.uniform(k4, (1,), jnp.float32, -bound2, bound2)
    return w1, b1, w2, b2


if __name__ == "__main__":
    key = jax.random.PRNGKey(0)
    k_x, k_p, k_x2 = jax.random.split(key, 3)

    input_dim = 32  # config['input_dim']
    w1, b1, w2, b2 = init_params(k_p, input_dim)

    def ref_fn(x):
        # Plain-JAX reference: same math as the PyTorch module.
        return jnp.maximum(x @ w1 + b1, 0.0) @ w2 + b2

    # Small batch (single block, grid of 1).
    x_small = jax.random.normal(k_x, (8, input_dim), jnp.float32)
    out_small = jax.block_until_ready(mlp_small_forward(x_small, w1, b1, w2, b2))
    assert out_small.shape == (8, 1)
    assert jnp.allclose(out_small, ref_fn(x_small), atol=1e-4, rtol=1e-4)

    # Larger, non-tile-aligned batch: exercises the batch-tiled grid + padding.
    x_big = jax.random.normal(k_x2, (4100, input_dim), jnp.float32)
    out_big = jax.block_until_ready(mlp_small_forward(x_big, w1, b1, w2, b2))
    assert out_big.shape == (4100, 1)
    assert jnp.allclose(out_big, ref_fn(x_big), atol=1e-4, rtol=1e-4)

    print("KERNEL_OK")
</pallas_src>

<mosaic_0001>
module attributes {stable_mosaic.version = 11 : i64} {
  func.func @mlp_small_kernel(%arg0: i32, %arg1: memref<8x32xf32, #tpu.memory_space<vmem>>, %arg2: memref<32x10xf32, #tpu.memory_space<vmem>>, %arg3: memref<1x10xf32, #tpu.memory_space<vmem>>, %arg4: memref<1x10xf32, #tpu.memory_space<vmem>>, %arg5: memref<1x1xf32, #tpu.memory_space<smem>>, %arg6: memref<8x1xf32, #tpu.memory_space<vmem>>) attributes {dimension_semantics = [#tpu.dimension_semantics<parallel>], iteration_bounds = array<i64: 1>, scalar_prefetch = 0 : i64, scratch_operands = 0 : i64, tpu.core_type = #tpu.core_type<tc>, window_params = [{transform_indices = @transform_0, window_bounds = array<i64: 8, 32>}, {pipeline_mode = #tpu.pipeline_mode<synchronous>, transform_indices = @transform_1, window_bounds = array<i64: 32, 10>}, {pipeline_mode = #tpu.pipeline_mode<synchronous>, transform_indices = @transform_2, window_bounds = array<i64: 1, 10>}, {pipeline_mode = #tpu.pipeline_mode<synchronous>, transform_indices = @transform_3, window_bounds = array<i64: 1, 10>}, {transform_indices = @transform_4, window_bounds = array<i64: 1, 1>}, {transform_indices = @transform_5, window_bounds = array<i64: 8, 1>}]} {
    %c0 = arith.constant 0 : index
    %c0_0 = arith.constant 0 : index
    %0 = vector.load %arg1[%c0, %c0_0] : memref<8x32xf32, #tpu.memory_space<vmem>>, vector<8x32xf32>
    %c0_1 = arith.constant 0 : index
    %c0_2 = arith.constant 0 : index
    %1 = vector.load %arg2[%c0_1, %c0_2] : memref<32x10xf32, #tpu.memory_space<vmem>>, vector<32x10xf32>
    %cst = arith.constant dense<0.000000e+00> : vector<8x10xf32>
    %2 = tpu.matmul %0, %1, %cst {dimension_numbers = #tpu.dot_dimension_numbers<[1], [0], [0], [1], [0, 0, 1, 1], [], []>} : vector<8x32xf32>, vector<32x10xf32>, vector<8x10xf32> -> vector<8x10xf32>
    %c0_3 = arith.constant 0 : index
    %c0_4 = arith.constant 0 : index
    %3 = vector.load %arg3[%c0_3, %c0_4] : memref<1x10xf32, #tpu.memory_space<vmem>>, vector<1x10xf32>
    %4 = vector.broadcast %3 : vector<1x10xf32> to vector<8x10xf32>
    %5 = arith.addf %2, %4 : vector<8x10xf32>
    %cst_5 = arith.constant 0.000000e+00 : f32
    %6 = vector.broadcast %cst_5 : f32 to vector<8x10xf32>
    %7 = arith.maximumf %5, %6 : vector<8x10xf32>
    %c0_6 = arith.constant 0 : index
    %c0_7 = arith.constant 0 : index
    %8 = vector.load %arg4[%c0_6, %c0_7] : memref<1x10xf32, #tpu.memory_space<vmem>>, vector<1x10xf32>
    %9 = vector.broadcast %8 : vector<1x10xf32> to vector<8x10xf32>
    %10 = arith.mulf %7, %9 : vector<8x10xf32>
    %cst_8 = arith.constant dense<0.000000e+00> : vector<8xf32>
    %11 = vector.multi_reduction <add>, %10, %cst_8 [1] : vector<8x10xf32> to vector<8xf32>
    %12 = vector.shape_cast %11 : vector<8xf32> to vector<8x1xf32>
    %c0_9 = arith.constant 0 : index
    %c0_10 = arith.constant 0 : index
    %13 = memref.load %arg5[%c0_9, %c0_10] : memref<1x1xf32, #tpu.memory_space<smem>>
    %14 = vector.broadcast %13 : f32 to vector<8x1xf32>
    %15 = arith.addf %12, %14 : vector<8x1xf32>
    %c0_11 = arith.constant 0 : index
    %c0_12 = arith.constant 0 : index
    %16 = vector.load %arg6[%c0_11, %c0_12] : memref<8x1xf32, #tpu.memory_space<vmem>>, vector<8x1xf32>
    tpu.vector_store %arg6[%c0_11, %c0_12], %15 {strides = array<i32>} : memref<8x1xf32, #tpu.memory_space<vmem>>, vector<8x1xf32>,
    return
  }
  func.func @transform_0(%arg0: i32) -> (i32, i32) {
    %c0_i32 = arith.constant 0 : i32
    %c0_i32_0 = arith.constant 0 : i32
    return %arg0, %c0_i32 : i32, i32
  }
  func.func @transform_1(%arg0: i32) -> (i32, i32) {
    %c0_i32 = arith.constant 0 : i32
    %c0_i32_0 = arith.constant 0 : i32
    %c0_i32_1 = arith.constant 0 : i32
    return %c0_i32, %c0_i32_0 : i32, i32
  }
  func.func @transform_2(%arg0: i32) -> (i32, i32) {
    %c0_i32 = arith.constant 0 : i32
    %c0_i32_0 = arith.constant 0 : i32
    %c0_i32_1 = arith.constant 0 : i32
    return %c0_i32, %c0_i32_0 : i32, i32
  }
  func.func @transform_3(%arg0: i32) -> (i32, i32) {
    %c0_i32 = arith.constant 0 : i32
    %c0_i32_0 = arith.constant 0 : i32
    %c0_i32_1 = arith.constant 0 : i32
    return %c0_i32, %c0_i32_0 : i32, i32
  }
  func.func @transform_4(%arg0: i32) -> (i32, i32) {
    %c0_i32 = arith.constant 0 : i32
    %c0_i32_0 = arith.constant 0 : i32
    %c0_i32_1 = arith.constant 0 : i32
    return %c0_i32, %c0_i32_0 : i32, i32
  }
  func.func @transform_5(%arg0: i32) -> (i32, i32) {
    %c0_i32 = arith.constant 0 : i32
    %c0_i32_0 = arith.constant 0 : i32
    return %arg0, %c0_i32 : i32, i32
  }
}

</mosaic_0001>

<bundles_post_ra>
// kernel: mlp_small_forward.1
= control target key start
LH: loop header
LB: loop body
LE: loop exit
PB: predicated region body
PF: predicated region fallthrough
CT: control target
= control target key end

     0   :  { %v157_v0 = vmov 0.0|0.0   ;;  %vm158_vm0 = vmmov 0   ;;  %v159_v4 = vmov 0.0   ;;  %vm33_vm1 = vcmask 261120   ;;  %s217_s1 = inlined_call_operand.vmem [shape: f32[32,10], index: 1, kind: input, shape index: {}]   ;;  %s218_s0 = inlined_call_operand.vmem [shape: f32[8,32], index: 0, kind: input, shape index: {}]   ;;  %s219_s2 = inlined_call_operand.vmem [shape: f32[1,10], index: 2, kind: input, shape index: {}]   ;;  %s220_s3 = inlined_call_operand.vmem [shape: f32[1,10], index: 3, kind: input, shape index: {}]   ;;  %s221_s4 = inlined_call_operand.<no memory space> [shape: f32[1,1], index: 4, kind: input, shape index: {}]   ;;  %s222_s5 = inlined_call_operand.vmem [shape: f32[8,1], index: 5, kind: output, shape index: {}]  }
   0x1   :  { %148 = vmatprep.subr.bf16.mxu0 %v157_v0  ;;  %v22_v1 = vld [vmem:[%s217_s1] sm:$0xff]  ;;  %v23_v2 = vld [vmem:[%s217_s1 + $0x8] sm:$0xff]  ;;  %v24_v3 = vld [vmem:[%s217_s1 + $0x10] sm:$0xff]  ;;  %145 = vmatprep.mubr.msk.f32.mxu0 %vm158_vm0, %v159_v4  ;;  %vm116_vm2 = vcmask 80896   ;;  %v121_v17 = vstv %s221_s4  ;;  %vm123_vm3 = vcmask 7168  }
   0x2   :  { %v149_v5 = vpack.c.bf16 %v23_v2, %v22_v1  ;;  %v25_v6 = vld [vmem:[%s217_s1 + $0x18] sm:$0xff]  ;;  %v21_v8 = vld [vmem:[%s218_s0] sm:$0xff] }
   0x3   :  { %v152_v7 = vpack.c.bf16 %v25_v6, %v24_v3  ;;  %v129_v9 = vld [vmem:[%s219_s2] ss:$0 sm:$0xff] }
   0x4   :  { %150 = vmatpush3.bf16.msra.mxu0 %v149_v5  ;;  %v131_v13 = vld [vmem:[%s220_s3] ss:$0 sm:$0xff] }
   0x5   :  { %151 = vmatprep.subr.bf16.mxu0 %v157_v0 }
   0x8   :  { %153 = vmatpush3.bf16.msra.mxu0 %v152_v7 }
   0xb   :  { %146 = vmatmul.mubr.msk.f32.vlgmr.msra.gmra.mrb[0].mxu0 %vm33_vm1, %v21_v8 }
  0xde   :  { %v103_v10 = vpop.f32.mrb[0].mxu0 }
  0xdf   :  { %v104_v11 = vadd.f32 %v129_v9, %v103_v10  ;;  %v147_v12 = vpop.f32.mrb[1].mxu0 }
  0xe1   :  { %v107_v14 = vmax.f32 %v104_v11, 0.0 }
  0xe3   :  { %v115_v15 = vmul.f32 %v131_v13, %v107_v14 }
  0xe5   :  { %v117_v16 = vsel %vm116_vm2, %v115_v15, 0.0 }
  0xe6   :  { %118 = vadd.xlane.f32.xlu0 %v117_v16 }
 0x173   :  { %v119_v18 = vpop.xlane.xlu0 %118 }
 0x174   :  { %v122_v19 = vadd.f32 %v121_v17, %v119_v18 }
 0x176   :  { %124 = vst.msk [vmem:[%s222_s5] sm:$0xff] %vm123_vm3, %v122_v19 }

</bundles_post_ra>
